<compile_context>
chip_gen: v5e
topology: v5e:2x2
jax: 0.10.0
libtpu: 0.0.40
codegen_flags: <defaults>
</compile_context>

<pallas_src>
import jax
import jax.numpy as jnp
from jax.experimental import pallas as pl
from jax.experimental.pallas import tpu as pltpu

# Set to jnp.bfloat16 to halve HBM traffic on the dominant patch stream (native MXU path
# on v6e/v7x). Kept float32 by default to preserve PyTorch f32 forward semantics to 1e-4.
MATMUL_DTYPE = jnp.float32


def conv_stats_kernel(p_ref, w_ref, y_ref, stats_ref):
    """Pass 1: per M-tile conv matmul (MXU) + per-channel partial BN statistics."""
    # (TM, KP) x (KP, CP) -> f32 accumulate on the MXU.
    y = jnp.dot(p_ref[...], w_ref[...], preferred_element_type=jnp.float32)
    y_ref[...] = y
    # Per-channel partial sums fused here while y is still in vregs (free vs. a
    # separate XLA reduction pass over y in HBM).
    s = jnp.sum(y, axis=0, keepdims=True)        # (1, CP)
    sq = jnp.sum(y * y, axis=0, keepdims=True)   # (1, CP)
    pad = jnp.zeros((6, y.shape[1]), jnp.float32)
    stats_ref[0] = jnp.concatenate([s, sq, pad], axis=0)   # full (8, CP) tile store


def bn_relu_kernel(y_ref, scale_ref, shift_ref, o_ref):
    """Pass 2: folded BatchNorm (single FMA per element) + ReLU, in place over y."""
    o_ref[...] = jnp.maximum(y_ref[...] * scale_ref[...] + shift_ref[...], 0.0)


def conv_block(x_nchw, w_oihw, gamma, beta, *, tile_m=256):
    """Forward pass of ConvBlock. x_nchw: (N, Cin, H, W); w_oihw: (Cout, Cin, 3, 3)."""
    N, Cin, H, W = x_nchw.shape
    Cout = w_oihw.shape[0]
    K = 9 * Cin
    M = N * H * W

    KP = 128 * pl.cdiv(K, 128)        # contraction depth padded to full MXU tiles
    CP = 128 * pl.cdiv(Cout, 128)     # lane-dense output channels
    MP = tile_m * pl.cdiv(M, tile_m)  # rows padded to a whole number of M-tiles
    num_tiles = MP // tile_m

    # ---- glue: NCHW -> NHWC, zero-pad, im2col, zero-pad K and M ----
    # TODO(synk): build the patch tile in-kernel from a halo-tiled NHWC block
    # (overlapping-window BlockSpec) to remove the 9x im2col HBM read; kept
    # wrapper-side here for lowering robustness.
    x = jnp.transpose(x_nchw, (0, 2, 3, 1)).astype(jnp.float32)           # (N, H, W, Cin)
    x_pad = jnp.pad(x, ((0, 0), (1, 1), (1, 1), (0, 0)))                   # (N, H+2, W+2, Cin)
    taps = [x_pad[:, dy:dy + H, dx:dx + W, :] for dy in range(3) for dx in range(3)]
    patches = jnp.stack(taps, axis=3).reshape(M, K)                        # (M, 9*Cin)
    patches = jnp.pad(patches, ((0, MP - M), (0, KP - K))).astype(MATMUL_DTYPE)

    # weights: (Cout, Cin, 3, 3) -> (3, 3, Cin, Cout) -> (9*Cin, Cout), padded to (KP, CP)
    w_mat = jnp.transpose(w_oihw, (2, 3, 1, 0)).reshape(K, Cout).astype(jnp.float32)
    w_mat = jnp.pad(w_mat, ((0, KP - K), (0, CP - Cout))).astype(MATMUL_DTYPE)

    # ---- pass 1: tiled conv matmul + per-tile BN partial stats ----
    y, stats = pl.pallas_call(
        conv_stats_kernel,
        out_shape=(jax.ShapeDtypeStruct((MP, CP), jnp.float32),
                   jax.ShapeDtypeStruct((num_tiles, 8, CP), jnp.float32)),
        grid=(num_tiles,),
        in_specs=[
            pl.BlockSpec((tile_m, KP), lambda i: (i, 0)),    # streamed patch tiles
            pl.BlockSpec((KP, CP), lambda i: (0, 0)),        # VMEM-resident weights
        ],
        out_specs=(
            pl.BlockSpec((tile_m, CP), lambda i: (i, 0)),    # pre-BN y (lane-dense)
            pl.BlockSpec((1, 8, CP), lambda i: (i, 0, 0)),   # per-tile partial stats
        ),
        compiler_params=pltpu.CompilerParams(dimension_semantics=("parallel",)),
    )(patches, w_mat)

    # ---- glue: O(Cout) BN fold (training-mode batch stats, biased var, eps=1e-5) ----
    # Zero-padded rows/channels contribute nothing; divide by the REAL row count M.
    # NOTE: E[y^2] - mean^2 is fine in f32 at these magnitudes; for very large M switch
    # to a per-tile centered (two-pass/Welford-style) accumulation.
    tot = jnp.sum(stats, axis=0)               # (8, CP)
    mean = tot[0] / M
    var = tot[1] / M - mean * mean
    gamma_p = jnp.pad(gamma.astype(jnp.float32), (0, CP - Cout))
    beta_p = jnp.pad(beta.astype(jnp.float32), (0, CP - Cout))
    scale = gamma_p * jax.lax.rsqrt(var + 1e-5)
    shift = beta_p - mean * scale

    # ---- pass 2: y = max(y*scale + shift, 0), written in place over y ----
    out = pl.pallas_call(
        bn_relu_kernel,
        out_shape=jax.ShapeDtypeStruct((MP, CP), jnp.float32),
        grid=(num_tiles,),
        in_specs=[
            pl.BlockSpec((tile_m, CP), lambda i: (i, 0)),
            pl.BlockSpec((1, CP), lambda i: (0, 0)),         # resident scale
            pl.BlockSpec((1, CP), lambda i: (0, 0)),         # resident shift
        ],
        out_specs=pl.BlockSpec((tile_m, CP), lambda i: (i, 0)),
        input_output_aliases={0: 0},
        compiler_params=pltpu.CompilerParams(dimension_semantics=("parallel",)),
    )(y, scale.reshape(1, CP), shift.reshape(1, CP))

    # ---- glue: strip padding, back to NCHW ----
    return jnp.transpose(out[:M, :Cout].reshape(N, H, W, Cout), (0, 3, 1, 2))


def conv_block_reference(x_nchw, w_oihw, gamma, beta):
    """Pure-JAX reference mirroring PyTorch ConvBlock forward (training-mode BN)."""
    y = jax.lax.conv_general_dilated(
        x_nchw.astype(jnp.float32), w_oihw.astype(jnp.float32),
        window_strides=(1, 1), padding="SAME",
        dimension_numbers=("NCHW", "OIHW", "NCHW"))
    mean = jnp.mean(y, axis=(0, 2, 3), keepdims=True)
    var = jnp.mean((y - mean) ** 2, axis=(0, 2, 3), keepdims=True)
    y = (y - mean) * jax.lax.rsqrt(var + 1e-5)
    y = y * gamma.reshape(1, -1, 1, 1) + beta.reshape(1, -1, 1, 1)
    return jnp.maximum(y, 0.0)


if __name__ == "__main__":
    N, Cin, Cout, H, W = 2, 4, 8, 16, 16

    key = jax.random.PRNGKey(0)
    kx, kw = jax.random.split(key)
    x = jax.random.normal(kx, (N, Cin, H, W), dtype=jnp.float32)
    # Deterministic conv weight init (Kaiming-uniform-like scale), bias=False per module.
    fan_in = Cin * 3 * 3
    bound = 1.0 / (fan_in ** 0.5)
    w = jax.random.uniform(kw, (Cout, Cin, 3, 3), dtype=jnp.float32,
                           minval=-bound, maxval=bound)
    # BatchNorm2d defaults: gamma=1, beta=0 (running stats not updated; forward only).
    gamma = jnp.ones((Cout,), dtype=jnp.float32)
    beta = jnp.zeros((Cout,), dtype=jnp.float32)

    out = jax.block_until_ready(jax.jit(conv_block)(x, w, gamma, beta))
    ref = jax.block_until_ready(conv_block_reference(x, w, gamma, beta))

    assert out.shape == (N, Cout, H, W)
    assert jnp.allclose(out, ref, atol=1e-4, rtol=1e-4), \
        float(jnp.max(jnp.abs(out - ref)))

    print("KERNEL_OK")
</pallas_src>

<mosaic_0001>
module attributes {stable_mosaic.version = 11 : i64} {
  func.func @conv_stats_kernel(%arg0: i32, %arg1: memref<256x128xf32, #tpu.memory_space<vmem>>, %arg2: memref<128x128xf32, #tpu.memory_space<vmem>>, %arg3: memref<256x128xf32, #tpu.memory_space<vmem>>, %arg4: memref<1x8x128xf32, #tpu.memory_space<vmem>>) attributes {dimension_semantics = [#tpu.dimension_semantics<parallel>], iteration_bounds = array<i64: 2>, scalar_prefetch = 0 : i64, scratch_operands = 0 : i64, tpu.core_type = #tpu.core_type<tc>, window_params = [{transform_indices = @transform_0, window_bounds = array<i64: 256, 128>}, {pipeline_mode = #tpu.pipeline_mode<synchronous>, transform_indices = @transform_1, window_bounds = array<i64: 128, 128>}, {transform_indices = @transform_2, window_bounds = array<i64: 256, 128>}, {transform_indices = @transform_3, window_bounds = array<i64: 1, 8, 128>}]} {
    %c0 = arith.constant 0 : index
    %c0_0 = arith.constant 0 : index
    %0 = vector.load %arg1[%c0, %c0_0] : memref<256x128xf32, #tpu.memory_space<vmem>>, vector<256x128xf32>
    %c0_1 = arith.constant 0 : index
    %c0_2 = arith.constant 0 : index
    %1 = vector.load %arg2[%c0_1, %c0_2] : memref<128x128xf32, #tpu.memory_space<vmem>>, vector<128x128xf32>
    %cst = arith.constant dense<0.000000e+00> : vector<256x128xf32>
    %2 = tpu.matmul %0, %1, %cst {dimension_numbers = #tpu.dot_dimension_numbers<[1], [0], [0], [1], [0, 0, 1, 1], [], []>} : vector<256x128xf32>, vector<128x128xf32>, vector<256x128xf32> -> vector<256x128xf32>
    %c0_3 = arith.constant 0 : index
    %c0_4 = arith.constant 0 : index
    %3 = vector.load %arg3[%c0_3, %c0_4] : memref<256x128xf32, #tpu.memory_space<vmem>>, vector<256x128xf32>
    tpu.vector_store %arg3[%c0_3, %c0_4], %2 {strides = array<i32>} : memref<256x128xf32, #tpu.memory_space<vmem>>, vector<256x128xf32>,
    %cst_5 = arith.constant dense<0.000000e+00> : vector<128xf32>
    %4 = vector.multi_reduction <add>, %2, %cst_5 [0] : vector<256x128xf32> to vector<128xf32>
    %5 = vector.shape_cast %4 : vector<128xf32> to vector<1x128xf32>
    %6 = arith.mulf %2, %2 : vector<256x128xf32>
    %cst_6 = arith.constant dense<0.000000e+00> : vector<128xf32>
    %7 = vector.multi_reduction <add>, %6, %cst_6 [0] : vector<256x128xf32> to vector<128xf32>
    %8 = vector.shape_cast %7 : vector<128xf32> to vector<1x128xf32>
    %cst_7 = arith.constant 0.000000e+00 : f32
    %9 = vector.broadcast %cst_7 : f32 to vector<6x128xf32>
    %10 = tpu.concatenate %5, %8, %9 in 0 : vector<1x128xf32>, vector<1x128xf32>, vector<6x128xf32> -> vector<8x128xf32>
    %c0_8 = arith.constant 0 : index
    %c0_9 = arith.constant 0 : index
    %c0_10 = arith.constant 0 : index
    %11 = vector.load %arg4[%c0_8, %c0_9, %c0_10] : memref<1x8x128xf32, #tpu.memory_space<vmem>>, vector<1x8x128xf32>
    %12 = vector.shape_cast %11 : vector<1x8x128xf32> to vector<8x128xf32>
    %13 = vector.shape_cast %10 : vector<8x128xf32> to vector<1x8x128xf32>
    tpu.vector_store %arg4[%c0_8, %c0_9, %c0_10], %13 {strides = array<i32>} : memref<1x8x128xf32, #tpu.memory_space<vmem>>, vector<1x8x128xf32>,
    return
  }
  func.func @transform_0(%arg0: i32) -> (i32, i32) {
    %c0_i32 = arith.constant 0 : i32
    %c0_i32_0 = arith.constant 0 : i32
    return %arg0, %c0_i32 : i32, i32
  }
  func.func @transform_1(%arg0: i32) -> (i32, i32) {
    %c0_i32 = arith.constant 0 : i32
    %c0_i32_0 = arith.constant 0 : i32
    %c0_i32_1 = arith.constant 0 : i32
    return %c0_i32, %c0_i32_0 : i32, i32
  }
  func.func @transform_2(%arg0: i32) -> (i32, i32) {
    %c0_i32 = arith.constant 0 : i32
    %c0_i32_0 = arith.constant 0 : i32
    return %arg0, %c0_i32 : i32, i32
  }
  func.func @transform_3(%arg0: i32) -> (i32, i32, i32) {
    %c0_i32 = arith.constant 0 : i32
    %c0_i32_0 = arith.constant 0 : i32
    %c0_i32_1 = arith.constant 0 : i32
    return %arg0, %c0_i32, %c0_i32_0 : i32, i32, i32
  }
}

module attributes {stable_mosaic.version = 11 : i64} {
  func.func @bn_relu_kernel(%arg0: i32, %arg1: memref<256x128xf32, #tpu.memory_space<vmem>>, %arg2: memref<1x128xf32, #tpu.memory_space<vmem>>, %arg3: memref<1x128xf32, #tpu.memory_space<vmem>>, %arg4: memref<256x128xf32, #tpu.memory_space<vmem>>) attributes {dimension_semantics = [#tpu.dimension_semantics<parallel>], iteration_bounds = array<i64: 2>, scalar_prefetch = 0 : i64, scratch_operands = 0 : i64, tpu.core_type = #tpu.core_type<tc>, window_params = [{transform_indices = @transform_0, window_bounds = array<i64: 256, 128>}, {pipeline_mode = #tpu.pipeline_mode<synchronous>, transform_indices = @transform_1, window_bounds = array<i64: 1, 128>}, {pipeline_mode = #tpu.pipeline_mode<synchronous>, transform_indices = @transform_2, window_bounds = array<i64: 1, 128>}, {transform_indices = @transform_3, window_bounds = array<i64: 256, 128>}]} {
    %c0 = arith.constant 0 : index
    %c0_0 = arith.constant 0 : index
    %0 = vector.load %arg1[%c0, %c0_0] : memref<256x128xf32, #tpu.memory_space<vmem>>, vector<256x128xf32>
    %c0_1 = arith.constant 0 : index
    %c0_2 = arith.constant 0 : index
    %1 = vector.load %arg2[%c0_1, %c0_2] : memref<1x128xf32, #tpu.memory_space<vmem>>, vector<1x128xf32>
    %2 = vector.broadcast %1 : vector<1x128xf32> to vector<256x128xf32>
    %3 = arith.mulf %0, %2 : vector<256x128xf32>
    %c0_3 = arith.constant 0 : index
    %c0_4 = arith.constant 0 : index
    %4 = vector.load %arg3[%c0_3, %c0_4] : memref<1x128xf32, #tpu.memory_space<vmem>>, vector<1x128xf32>
    %5 = vector.broadcast %4 : vector<1x128xf32> to vector<256x128xf32>
    %6 = arith.addf %3, %5 : vector<256x128xf32>
    %cst = arith.constant 0.000000e+00 : f32
    %7 = vector.broadcast %cst : f32 to vector<256x128xf32>
    %8 = arith.maximumf %6, %7 : vector<256x128xf32>
    %c0_5 = arith.constant 0 : index
    %c0_6 = arith.constant 0 : index
    %9 = vector.load %arg4[%c0_5, %c0_6] : memref<256x128xf32, #tpu.memory_space<vmem>>, vector<256x128xf32>
    tpu.vector_store %arg4[%c0_5, %c0_6], %8 {strides = array<i32>} : memref<256x128xf32, #tpu.memory_space<vmem>>, vector<256x128xf32>,
    return
  }
  func.func @transform_0(%arg0: i32) -> (i32, i32) {
    %c0_i32 = arith.constant 0 : i32
    %c0_i32_0 = arith.constant 0 : i32
    return %arg0, %c0_i32 : i32, i32
  }
  func.func @transform_1(%arg0: i32) -> (i32, i32) {
    %c0_i32 = arith.constant 0 : i32
    %c0_i32_0 = arith.constant 0 : i32
    %c0_i32_1 = arith.constant 0 : i32
    return %c0_i32, %c0_i32_0 : i32, i32
  }
  func.func @transform_2(%arg0: i32) -> (i32, i32) {
    %c0_i32 = arith.constant 0 : i32
    %c0_i32_0 = arith.constant 0 : i32
    %c0_i32_1 = arith.constant 0 : i32
    return %c0_i32, %c0_i32_0 : i32, i32
  }
  func.func @transform_3(%arg0: i32) -> (i32, i32) {
    %c0_i32 = arith.constant 0 : i32
    %c0_i32_0 = arith.constant 0 : i32
    return %arg0, %c0_i32 : i32, i32
  }
}

</mosaic_0001>

<bundles_post_ra>
// kernel: conv_block.3
= control target key start
LH: loop header
LB: loop body
LE: loop exit
PB: predicated region body
PF: predicated region fallthrough
CT: control target
= control target key end

     0   :  { %s447_s12 = smov 0   ;;  %s640_s0 = inlined_call_operand.vmem [shape: f32[512,128], index: 0, kind: input, shape index: {}, may-alias: {0,3}]   ;;  %s641_s1 = inlined_call_operand.vmem [shape: f32[1,128], index: 1, kind: input, shape index: {}]   ;;  %s642_s2 = inlined_call_operand.vmem [shape: f32[1,128], index: 2, kind: input, shape index: {}]   ;;  %s643_s3 = inlined_call_operand.vmem [shape: f32[512,128], index: 3, kind: output, shape index: {}, may-alias: {0,3}]  }
   0x1 LB: > { %s398_s13 = sadd.s32 4294967295, %s425_s12   ;;  %p402_p0 = scmp.ge.s32.totalorder %s425_s12, 1  ;;  %s425_s12 = sphi %s447_s12, %s13_s12  }
   0x2   : > { %p138_p1 = scmp.lt.s32.totalorder %s425_s12, 3 }
   0x4   : > { %p139_p2 = pnand %p402_p0, %p138_p1 }
   0x5   : > { %s403_s14 = sshll.u32 (!%p139_p2), %s398_s13, 5 }
   0x6   : > { %142 = sbr.rel (%p139_p2) target bundleno = 57 (0x39), region = 32  ;;  %p163_p3 = scmp.lt.s32.totalorder (!%p139_p2), %s403_s14, 63 }
   0xb   : > { %s645_s14 = smov (!%p163_p3, %s403_s14), 63  ;;  %v460_v0 = vld [vmem:[%s641_s1] ss:$0 sm:$0xff] }
   0xc   : > { %s404_s17 = sshll.u32 %s645_s14, 3  ;;  %v473_v1 = vld [vmem:[%s642_s2] ss:$0 sm:$0xff] }
   0xd   : > { %s468_s20 = scalar_lea.vmem %s640_s0, %s404_s17  ;;  %s508_s25 = scalar_lea.vmem %s643_s3, %s404_s17 }
   0xe   : > { %v174_v2 = vld [vmem:[%s468_s20] sm:$0xff]  ;;  %v175_v3 = vld [vmem:[%s468_s20 + $0x8] sm:$0xff]  ;;  %v176_v4 = vld [vmem:[%s468_s20 + $0x10] sm:$0xff] }
   0xf   : > { %v177_v5 = vld [vmem:[%s468_s20 + $0x18] sm:$0xff]  ;;  %v178_v6 = vld [vmem:[%s468_s20 + $0x20] sm:$0xff]  ;;  %v179_v7 = vld [vmem:[%s468_s20 + $0x28] sm:$0xff]  ;;  %v210_v8 = vmul.f32 %v460_v0, %v174_v2  ;;  %v211_v9 = vmul.f32 %v460_v0, %v175_v3  ;;  %v212_v10 = vmul.f32 %v460_v0, %v176_v4 }
  0x10   : > { %v180_v11 = vld [vmem:[%s468_s20 + $0x30] sm:$0xff]  ;;  %v213_v12 = vmul.f32 %v460_v0, %v177_v5  ;;  %v181_v13 = vld [vmem:[%s468_s20 + $0x38] sm:$0xff]  ;;  %v214_v15 = vmul.f32 %v460_v0, %v178_v6  ;;  %v182_v16 = vld [vmem:[%s468_s20 + $0x40] sm:$0xff]  ;;  %v215_v18 = vmul.f32 %v460_v0, %v179_v7 }
  0x11   : > { %v246_v14 = vadd.f32 %v473_v1, %v210_v8  ;;  %v247_v17 = vadd.f32 %v473_v1, %v211_v9  ;;  %v183_v19 = vld [vmem:[%s468_s20 + $0x48] sm:$0xff]  ;;  %v248_v20 = vadd.f32 %v473_v1, %v212_v10  ;;  %v216_v21 = vmul.f32 %v460_v0, %v180_v11  ;;  %v184_v22 = vld [vmem:[%s468_s20 + $0x50] sm:$0xff]  ;;  %v185_v25 = vld [vmem:[%s468_s20 + $0x58] sm:$0xff] }
  0x12   : > { %v249_v23 = vadd.f32 %v473_v1, %v213_v12  ;;  %v217_v24 = vmul.f32 %v460_v0, %v181_v13  ;;  %v186_v26 = vld [vmem:[%s468_s20 + $0x60] sm:$0xff]  ;;  %v187_v27 = vld [vmem:[%s468_s20 + $0x68] sm:$0xff]  ;;  %v250_v29 = vadd.f32 %v473_v1, %v214_v15  ;;  %v218_v30 = vmul.f32 %v460_v0, %v182_v16  ;;  %v188_v31 = vld [vmem:[%s468_s20 + $0x70] sm:$0xff] }
  0x13   : > { %v278_v28 = vmax.f32 %v246_v14, 0.0  ;;  %v189_v32 = vld [vmem:[%s468_s20 + $0x78] sm:$0xff]  ;;  %v190_v33 = vld [vmem:[%s468_s20 + $0x80] sm:$0xff]  ;;  %v191_v34 = vld [vmem:[%s468_s20 + $0x88] sm:$0xff]  ;;  %v279_v43 = vmax.f32 %v247_v17, 0.0  ;;  %v251_v44 = vadd.f32 %v473_v1, %v215_v18  ;;  %v219_v45 = vmul.f32 %v460_v0, %v183_v19 }
  0x14   : > { %v192_v35 = vld [vmem:[%s468_s20 + $0x90] sm:$0xff]  ;;  %v193_v36 = vld [vmem:[%s468_s20 + $0x98] sm:$0xff]  ;;  %v194_v37 = vld [vmem:[%s468_s20 + $0xa0] sm:$0xff]  ;;  %v280_v49 = vmax.f32 %v248_v20, 0.0  ;;  %v252_v50 = vadd.f32 %v473_v1, %v216_v21  ;;  %v220_v51 = vmul.f32 %v460_v0, %v184_v22  ;;  %v281_v55 = vmax.f32 %v249_v23, 0.0 }
  0x15   : > { %v195_v38 = vld [vmem:[%s468_s20 + $0xa8] sm:$0xff]  ;;  %v196_v39 = vld [vmem:[%s468_s20 + $0xb0] sm:$0xff]  ;;  %v520_v40 = vld [vmem:[%s468_s20 + $0xb8] sm:$0xff]  ;;  %v253_v56 = vadd.f32 %v473_v1, %v217_v24  ;;  %v221_v57 = vmul.f32 %v460_v0, %v185_v25  ;;  %v282_v58 = vmax.f32 %v250_v29, 0.0  ;;  %v254_v59 = vadd.f32 %v473_v1, %v218_v30 }
  0x16   : > { %v523_v41 = vld [vmem:[%s468_s20 + $0xc0] sm:$0xff]  ;;  %v526_v42 = vld [vmem:[%s468_s20 + $0xc8] sm:$0xff]  ;;  %v531_v46 = vld [vmem:[%s468_s20 + $0xd0] sm:$0xff]  ;;  %v222_v60 = vmul.f32 %v460_v0, %v186_v26  ;;  %v283_v61 = vmax.f32 %v251_v44, 0.0  ;;  %v255_v62 = vadd.f32 %v473_v1, %v219_v45  ;;  %v223_v63 = vmul.f32 %v460_v0, %v187_v27 }
  0x17   : > { %v534_v47 = vld [vmem:[%s468_s20 + $0xd8] sm:$0xff]  ;;  %v537_v48 = vld [vmem:[%s468_s20 + $0xe0] sm:$0xff]  ;;  %v542_v52 = vld [vmem:[%s468_s20 + $0xe8] sm:$0xff]  ;;  %v284_v2 = vmax.f32 %v252_v50, 0.0  ;;  %v256_v3 = vadd.f32 %v473_v1, %v220_v51  ;;  %v224_v4 = vmul.f32 %v460_v0, %v188_v31  ;;  %v285_v5 = vmax.f32 %v253_v56, 0.0 }
  0x18   : > { %v545_v53 = vld [vmem:[%s468_s20 + $0xf0] sm:$0xff]  ;;  %v548_v54 = vld [vmem:[%s468_s20 + $0xf8] sm:$0xff]  ;;  %v257_v6 = vadd.f32 %v473_v1, %v221_v57  ;;  %v225_v7 = vmul.f32 %v460_v0, %v189_v32  ;;  %v286_v8 = vmax.f32 %v254_v59, 0.0  ;;  %v258_v9 = vadd.f32 %v473_v1, %v222_v60 }
  0x19   : > { %310 = vst [vmem:[%s508_s25] sm:$0xff] %v278_v28  ;;  %v226_v10 = vmul.f32 %v460_v0, %v190_v33  ;;  %v287_v11 = vmax.f32 %v255_v62, 0.0  ;;  %v259_v12 = vadd.f32 %v473_v1, %v223_v63  ;;  %v227_v13 = vmul.f32 %v460_v0, %v191_v34 }
  0x1a   : > { %311 = vst [vmem:[%s508_s25 + $0x8] sm:$0xff] %v279_v43  ;;  %v288_v14 = vmax.f32 %v256_v3, 0.0  ;;  %v260_v15 = vadd.f32 %v473_v1, %v224_v4  ;;  %v228_v16 = vmul.f32 %v460_v0, %v192_v35  ;;  %v289_v17 = vmax.f32 %v257_v6, 0.0 }
  0x1b   : > { %312 = vst [vmem:[%s508_s25 + $0x10] sm:$0xff] %v280_v49  ;;  %v261_v18 = vadd.f32 %v473_v1, %v225_v7  ;;  %v229_v19 = vmul.f32 %v460_v0, %v193_v36  ;;  %v290_v20 = vmax.f32 %v258_v9, 0.0  ;;  %v262_v21 = vadd.f32 %v473_v1, %v226_v10 }
  0x1c   : > { %313 = vst [vmem:[%s508_s25 + $0x18] sm:$0xff] %v281_v55  ;;  %v230_v22 = vmul.f32 %v460_v0, %v194_v37  ;;  %v291_v23 = vmax.f32 %v259_v12, 0.0  ;;  %v263_v24 = vadd.f32 %v473_v1, %v227_v13  ;;  %v231_v25 = vmul.f32 %v460_v0, %v195_v38 }
  0x1d   : > { %314 = vst [vmem:[%s508_s25 + $0x20] sm:$0xff] %v282_v58  ;;  %v292_v26 = vmax.f32 %v260_v15, 0.0  ;;  %v264_v27 = vadd.f32 %v473_v1, %v228_v16  ;;  %v232_v28 = vmul.f32 %v460_v0, %v196_v39  ;;  %v293_v29 = vmax.f32 %v261_v18, 0.0 }
  0x1e   : > { %315 = vst [vmem:[%s508_s25 + $0x28] sm:$0xff] %v283_v61  ;;  %v265_v30 = vadd.f32 %v473_v1, %v229_v19  ;;  %v233_v31 = vmul.f32 %v460_v0, %v520_v40  ;;  %v294_v32 = vmax.f32 %v262_v21, 0.0  ;;  %v266_v33 = vadd.f32 %v473_v1, %v230_v22 }
  0x1f   : > { %316 = vst [vmem:[%s508_s25 + $0x30] sm:$0xff] %v284_v2  ;;  %v234_v34 = vmul.f32 %v460_v0, %v523_v41  ;;  %v295_v35 = vmax.f32 %v263_v24, 0.0  ;;  %v267_v36 = vadd.f32 %v473_v1, %v231_v25  ;;  %v235_v37 = vmul.f32 %v460_v0, %v526_v42 }
  0x20   : > { %317 = vst [vmem:[%s508_s25 + $0x38] sm:$0xff] %v285_v5  ;;  %v296_v38 = vmax.f32 %v264_v27, 0.0  ;;  %v268_v39 = vadd.f32 %v473_v1, %v232_v28  ;;  %v236_v40 = vmul.f32 %v460_v0, %v531_v46  ;;  %v297_v43 = vmax.f32 %v265_v30, 0.0 }
  0x21   : > { %318 = vst [vmem:[%s508_s25 + $0x40] sm:$0xff] %v286_v8  ;;  %v269_v41 = vadd.f32 %v473_v1, %v233_v31  ;;  %v237_v44 = vmul.f32 %v460_v0, %v534_v47  ;;  %v298_v45 = vmax.f32 %v266_v33, 0.0  ;;  %v270_v42 = vadd.f32 %v473_v1, %v234_v34 }
  0x22   : > { %319 = vst [vmem:[%s508_s25 + $0x48] sm:$0xff] %v287_v11  ;;  %v238_v49 = vmul.f32 %v460_v0, %v537_v48  ;;  %v299_v50 = vmax.f32 %v267_v36, 0.0  ;;  %v271_v46 = vadd.f32 %v473_v1, %v235_v37  ;;  %v239_v51 = vmul.f32 %v460_v0, %v542_v52 }
  0x23   : > { %320 = vst [vmem:[%s508_s25 + $0x50] sm:$0xff] %v288_v14  ;;  %v300_v55 = vmax.f32 %v268_v39, 0.0  ;;  %v272_v47 = vadd.f32 %v473_v1, %v236_v40  ;;  %v240_v56 = vmul.f32 %v460_v0, %v545_v53  ;;  %v301_v48 = vmax.f32 %v269_v41, 0.0 }
  0x24   : > { %321 = vst [vmem:[%s508_s25 + $0x58] sm:$0xff] %v289_v17  ;;  %v273_v57 = vadd.f32 %v473_v1, %v237_v44  ;;  %v241_v58 = vmul.f32 %v460_v0, %v548_v54  ;;  %v302_v52 = vmax.f32 %v270_v42, 0.0  ;;  %v274_v59 = vadd.f32 %v473_v1, %v238_v49 }
  0x25   : > { %322 = vst [vmem:[%s508_s25 + $0x60] sm:$0xff] %v290_v20  ;;  %v303_v60 = vmax.f32 %v271_v46, 0.0  ;;  %v275_v53 = vadd.f32 %v473_v1, %v239_v51  ;;  %v304_v61 = vmax.f32 %v272_v47, 0.0  ;;  %v276_v62 = vadd.f32 %v473_v1, %v240_v56 }
  0x26   : > { %323 = vst [vmem:[%s508_s25 + $0x68] sm:$0xff] %v291_v23  ;;  %v305_v0 = vmax.f32 %v273_v57, 0.0  ;;  %v277_v54 = vadd.f32 %v473_v1, %v241_v58  ;;  %v306_v63 = vmax.f32 %v274_v59, 0.0 }
  0x27   : > { %324 = vst [vmem:[%s508_s25 + $0x70] sm:$0xff] %v292_v26  ;;  %v307_v2 = vmax.f32 %v275_v53, 0.0  ;;  %v308_v3 = vmax.f32 %v276_v62, 0.0 }
  0x28   : > { %325 = vst [vmem:[%s508_s25 + $0x78] sm:$0xff] %v293_v29  ;;  %v309_v4 = vmax.f32 %v277_v54, 0.0 }
  0x29   : > { %326 = vst [vmem:[%s508_s25 + $0x80] sm:$0xff] %v294_v32 }
  0x2a   : > { %327 = vst [vmem:[%s508_s25 + $0x88] sm:$0xff] %v295_v35 }
  0x2b   : > { %328 = vst [vmem:[%s508_s25 + $0x90] sm:$0xff] %v296_v38 }
  0x2c   : > { %329 = vst [vmem:[%s508_s25 + $0x98] sm:$0xff] %v297_v43 }
  0x2d   : > { %330 = vst [vmem:[%s508_s25 + $0xa0] sm:$0xff] %v298_v45 }
  0x2e   : > { %331 = vst [vmem:[%s508_s25 + $0xa8] sm:$0xff] %v299_v50 }
  0x2f   : > { %332 = vst [vmem:[%s508_s25 + $0xb0] sm:$0xff] %v300_v55 }
  0x30   : > { %333 = vst [vmem:[%s508_s25 + $0xb8] sm:$0xff] %v301_v48 }
  0x31   : > { %334 = vst [vmem:[%s508_s25 + $0xc0] sm:$0xff] %v302_v52 }
  0x32   : > { %335 = vst [vmem:[%s508_s25 + $0xc8] sm:$0xff] %v303_v60 }
  0x33   : > { %336 = vst [vmem:[%s508_s25 + $0xd0] sm:$0xff] %v304_v61 }
  0x34   : > { %337 = vst [vmem:[%s508_s25 + $0xd8] sm:$0xff] %v305_v0 }
  0x35   : > { %338 = vst [vmem:[%s508_s25 + $0xe0] sm:$0xff] %v306_v63 }
  0x36   : > { %339 = vst [vmem:[%s508_s25 + $0xe8] sm:$0xff] %v307_v2 }
  0x37   : > { %340 = vst [vmem:[%s508_s25 + $0xf0] sm:$0xff] %v308_v3 }
  0x38   : > { %341 = vst [vmem:[%s508_s25 + $0xf8] sm:$0xff] %v309_v4 }
  0x39 PF: > { %s13_s12 = sadd.s32 1, %s425_s12  }
  0x3a   : > { %p10_p4 = scmp.ge.s32.totalorder %s13_s12, 4  }
  0x3c   :  { %12 = sbr.rel (!%p10_p4) target bundleno = 1 (0x1), region = 62 }

// kernel: conv_block.2
= control target key start
LH: loop header
LB: loop body
LE: loop exit
PB: predicated region body
PF: predicated region fallthrough
CT: control target
= control target key end

     0   :  { %s672_s12 = smov 0   ;;  %s928_s0 = inlined_call_operand.vmem [shape: f32[512,128], index: 0, kind: input, shape index: {}]   ;;  %s929_s1 = inlined_call_operand.vmem [shape: f32[128,128], index: 1, kind: input, shape index: {}]   ;;  %s930_s2 = inlined_call_operand.vmem [shape: f32[512,128], index: 2, kind: output, shape index: {0}]   ;;  %s931_s3 = inlined_call_operand.vmem [shape: f32[2,8,128], index: 3, kind: output, shape index: {1}]  }
   0x1 LB: > { %s678_s13 = sadd.s32 4294967295, %s650_s12   ;;  %p580_p0 = scmp.ge.s32.totalorder %s650_s12, 1  ;;  %s650_s12 = sphi %s672_s12, %s14_s12  }
   0x2   : > { %p141_p1 = scmp.lt.s32.totalorder %s650_s12, 3 }
   0x4   : > { %p142_p2 = pnand %p580_p0, %p141_p1 }
   0x5   : > { %s581_s30 = sshll.u32 (!%p142_p2), %s678_s13, 5  ;;  %p181_p4 = scmp.lt.s32.totalorder (!%p142_p2), %s678_s13, 1 }
   0x6   : > { %145 = sbr.rel (%p142_p2) target bundleno = 292 (0x124), region = 28  ;;  %p170_p3 = scmp.lt.s32.totalorder (!%p142_p2), %s581_s30, 63 }
   0xb   : > { %v232_v0 = vld [vmem:[%s929_s1 + $0x78] sm:$0xff]  ;;  %v231_v1 = vld [vmem:[%s929_s1 + $0x70] sm:$0xff]  ;;  %v230_v2 = vld [vmem:[%s929_s1 + $0x68] sm:$0xff]  ;;  %s933_s30 = smov (!%p170_p3, %s581_s30), 63  ;;  %s935_s13 = smov (!%p181_p4, %s678_s13), 1  ;;  %vm484_vm0 = vcmask 1040384  }
   0xc   : > { %233 = vmatpush.msra.mxu0 %v232_v0  ;;  %588 = vmatpush.msra.mxu1 %v232_v0  ;;  %v229_v3 = vld [vmem:[%s929_s1 + $0x60] sm:$0xff]  ;;  %v228_v4 = vld [vmem:[%s929_s1 + $0x58] sm:$0xff]  ;;  %v227_v5 = vld [vmem:[%s929_s1 + $0x50] sm:$0xff]  ;;  %s582_s16 = sshll.u32 %s933_s30, 3  ;;  %s585_s29 = sshll.u32 %s935_s13, 3  ;;  %vm486_vm1 = vcmask 1041408  }
   0xd   : > { %589 = vmatpush.msra.mxu2 %v232_v0  ;;  %590 = vmatpush.msra.mxu3 %v232_v0  ;;  %v226_v6 = vld [vmem:[%s929_s1 + $0x48] sm:$0xff]  ;;  %v225_v7 = vld [vmem:[%s929_s1 + $0x40] sm:$0xff]  ;;  %v224_v8 = vld [vmem:[%s929_s1 + $0x38] sm:$0xff]  ;;  %s736_s23 = scalar_lea.vmem %s928_s0, %s582_s16  ;;  %s778_s28 = scalar_lea.vmem %s930_s2, %s582_s16 }
   0xe   : > { %234 = vmatpush.msra.mxu0 %v231_v1  ;;  %591 = vmatpush.msra.mxu1 %v231_v1  ;;  %v223_v9 = vld [vmem:[%s929_s1 + $0x30] sm:$0xff]  ;;  %v222_v10 = vld [vmem:[%s929_s1 + $0x28] sm:$0xff]  ;;  %v221_v11 = vld [vmem:[%s929_s1 + $0x20] sm:$0xff]  ;;  %s184_s5 = scalar_lea.vmem %s931_s3, %s585_s29 }
   0xf   : > { %592 = vmatpush.msra.mxu2 %v231_v1  ;;  %593 = vmatpush.msra.mxu3 %v231_v1  ;;  %v220_v12 = vld [vmem:[%s929_s1 + $0x18] sm:$0xff]  ;;  %v219_v13 = vld [vmem:[%s929_s1 + $0x10] sm:$0xff]  ;;  %v218_v14 = vld [vmem:[%s929_s1 + $0x8] sm:$0xff] }
  0x10   : > { %235 = vmatpush.msra.mxu0 %v230_v2  ;;  %594 = vmatpush.msra.mxu1 %v230_v2  ;;  %v217_v15 = vld [vmem:[%s929_s1] sm:$0xff]  ;;  %v186_v19 = vld [vmem:[%s736_s23 + $0x8] sm:$0xff]  ;;  %v187_v23 = vld [vmem:[%s736_s23 + $0x10] sm:$0xff] }
  0x11   : > { %595 = vmatpush.msra.mxu2 %v230_v2  ;;  %596 = vmatpush.msra.mxu3 %v230_v2  ;;  %v185_v16 = vld [vmem:[%s736_s23] sm:$0xff]  ;;  %v194_v20 = vld [vmem:[%s736_s23 + $0x48] sm:$0xff]  ;;  %v195_v24 = vld [vmem:[%s736_s23 + $0x50] sm:$0xff] }
  0x12   : > { %236 = vmatpush.msra.mxu0 %v229_v3  ;;  %597 = vmatpush.msra.mxu1 %v229_v3  ;;  %v193_v17 = vld [vmem:[%s736_s23 + $0x40] sm:$0xff]  ;;  %v202_v21 = vld [vmem:[%s736_s23 + $0x88] sm:$0xff]  ;;  %v203_v25 = vld [vmem:[%s736_s23 + $0x90] sm:$0xff] }
  0x13   : > { %598 = vmatpush.msra.mxu2 %v229_v3  ;;  %599 = vmatpush.msra.mxu3 %v229_v3  ;;  %v201_v18 = vld [vmem:[%s736_s23 + $0x80] sm:$0xff]  ;;  %v210_v26 = vld [vmem:[%s736_s23 + $0xc8] sm:$0xff]  ;;  %v188_v27 = vld [vmem:[%s736_s23 + $0x18] sm:$0xff] }
  0x14   : > { %237 = vmatpush.msra.mxu0 %v228_v4  ;;  %600 = vmatpush.msra.mxu1 %v228_v4  ;;  %v209_v22 = vld [vmem:[%s736_s23 + $0xc0] sm:$0xff]  ;;  %v196_v28 = vld [vmem:[%s736_s23 + $0x58] sm:$0xff]  ;;  %v211_v30 = vld [vmem:[%s736_s23 + $0xd0] sm:$0xff] }
  0x15   : > { %601 = vmatpush.msra.mxu2 %v228_v4  ;;  %602 = vmatpush.msra.mxu3 %v228_v4  ;;  %v204_v29 = vld [vmem:[%s736_s23 + $0x98] sm:$0xff]  ;;  %v189_v31 = vld [vmem:[%s736_s23 + $0x20] sm:$0xff]  ;;  %v190_v35 = vld [vmem:[%s736_s23 + $0x28] sm:$0xff] }
  0x16   : > { %238 = vmatpush.msra.mxu0 %v227_v5  ;;  %603 = vmatpush.msra.mxu1 %v227_v5  ;;  %v197_v32 = vld [vmem:[%s736_s23 + $0x60] sm:$0xff]  ;;  %v212_v33 = vld [vmem:[%s736_s23 + $0xd8] sm:$0xff]  ;;  %v198_v36 = vld [vmem:[%s736_s23 + $0x68] sm:$0xff] }
  0x17   : > { %604 = vmatpush.msra.mxu2 %v227_v5  ;;  %605 = vmatpush.msra.mxu3 %v227_v5  ;;  %v205_v34 = vld [vmem:[%s736_s23 + $0xa0] sm:$0xff]  ;;  %v206_v38 = vld [vmem:[%s736_s23 + $0xa8] sm:$0xff]  ;;  %v191_v39 = vld [vmem:[%s736_s23 + $0x30] sm:$0xff] }
  0x18   : > { %239 = vmatpush.msra.mxu0 %v226_v6  ;;  %606 = vmatpush.msra.mxu1 %v226_v6  ;;  %v213_v37 = vld [vmem:[%s736_s23 + $0xe0] sm:$0xff]  ;;  %v199_v40 = vld [vmem:[%s736_s23 + $0x70] sm:$0xff]  ;;  %v214_v41 = vld [vmem:[%s736_s23 + $0xe8] sm:$0xff] }
  0x19   : > { %607 = vmatpush.msra.mxu2 %v226_v6  ;;  %608 = vmatpush.msra.mxu3 %v226_v6  ;;  %v207_v42 = vld [vmem:[%s736_s23 + $0xb0] sm:$0xff]  ;;  %v192_v43 = vld [vmem:[%s736_s23 + $0x38] sm:$0xff] }
  0x1a   : > { %240 = vmatpush.msra.mxu0 %v225_v7  ;;  %609 = vmatpush.msra.mxu1 %v225_v7  ;;  %v200_v44 = vld [vmem:[%s736_s23 + $0x78] sm:$0xff]  ;;  %v215_v45 = vld [vmem:[%s736_s23 + $0xf0] sm:$0xff] }
  0x1b   : > { %610 = vmatpush.msra.mxu2 %v225_v7  ;;  %611 = vmatpush.msra.mxu3 %v225_v7  ;;  %v208_v46 = vld [vmem:[%s736_s23 + $0xb8] sm:$0xff] }
  0x1c   : > { %241 = vmatpush.msra.mxu0 %v224_v8  ;;  %612 = vmatpush.msra.mxu1 %v224_v8  ;;  %v216_v47 = vld [vmem:[%s736_s23 + $0xf8] sm:$0xff] }
  0x1d   : > { %613 = vmatpush.msra.mxu2 %v224_v8  ;;  %614 = vmatpush.msra.mxu3 %v224_v8 }
  0x1e   : > { %242 = vmatpush.msra.mxu0 %v223_v9  ;;  %615 = vmatpush.msra.mxu1 %v223_v9 }
  0x1f   : > { %616 = vmatpush.msra.mxu2 %v223_v9  ;;  %617 = vmatpush.msra.mxu3 %v223_v9 }
  0x20   : > { %243 = vmatpush.msra.mxu0 %v222_v10  ;;  %618 = vmatpush.msra.mxu1 %v222_v10 }
  0x21   : > { %619 = vmatpush.msra.mxu2 %v222_v10  ;;  %620 = vmatpush.msra.mxu3 %v222_v10 }
  0x22   : > { %244 = vmatpush.msra.mxu0 %v221_v11  ;;  %621 = vmatpush.msra.mxu1 %v221_v11 }
  0x23   : > { %622 = vmatpush.msra.mxu2 %v221_v11  ;;  %623 = vmatpush.msra.mxu3 %v221_v11 }
  0x24   : > { %245 = vmatpush.msra.mxu0 %v220_v12  ;;  %624 = vmatpush.msra.mxu1 %v220_v12 }
  0x25   : > { %625 = vmatpush.msra.mxu2 %v220_v12  ;;  %626 = vmatpush.msra.mxu3 %v220_v12 }
  0x26   : > { %246 = vmatpush.msra.mxu0 %v219_v13  ;;  %627 = vmatpush.msra.mxu1 %v219_v13 }
  0x27   : > { %628 = vmatpush.msra.mxu2 %v219_v13  ;;  %629 = vmatpush.msra.mxu3 %v219_v13 }
  0x28   : > { %247 = vmatpush.msra.mxu0 %v218_v14  ;;  %630 = vmatpush.msra.mxu1 %v218_v14 }
  0x29   : > { %631 = vmatpush.msra.mxu2 %v218_v14  ;;  %632 = vmatpush.msra.mxu3 %v218_v14 }
  0x2a   : > { %248 = vmatpush.msra.mxu0 %v217_v15  ;;  %633 = vmatpush.msra.mxu1 %v217_v15 }
  0x2b   : > { %249 = vmatmul.f32.vlgmr.msra.gmra.mxu0 %v185_v16  ;;  %273 = vmatmul.f32.vlgmr.msra.gmra.mxu1 %v193_v17 }
  0x2c   : > { %634 = vmatpush.msra.mxu2 %v217_v15  ;;  %635 = vmatpush.msra.mxu3 %v217_v15 }
  0x2d   : > { %297 = vmatmul.f32.vlgmr.msra.gmra.mxu2 %v201_v18  ;;  %321 = vmatmul.f32.vlgmr.msra.gmra.mxu3 %v209_v22 }
  0x33   : > { %252 = vmatmul.f32.gmra.mxu0 %v186_v19  ;;  %276 = vmatmul.f32.gmra.mxu1 %v194_v20 }
  0x35   : > { %300 = vmatmul.f32.gmra.mxu2 %v202_v21  ;;  %324 = vmatmul.f32.gmra.mxu3 %v210_v26 }
  0x3b   : > { %255 = vmatmul.f32.gmra.mxu0 %v187_v23  ;;  %279 = vmatmul.f32.gmra.mxu1 %v195_v24 }
  0x3d   : > { %303 = vmatmul.f32.gmra.mxu2 %v203_v25  ;;  %327 = vmatmul.f32.gmra.mxu3 %v211_v30 }
  0x43   : > { %258 = vmatmul.f32.gmra.mxu0 %v188_v27  ;;  %282 = vmatmul.f32.gmra.mxu1 %v196_v28 }
  0x45   : > { %306 = vmatmul.f32.gmra.mxu2 %v204_v29  ;;  %330 = vmatmul.f32.gmra.mxu3 %v212_v33 }
  0x4b   : > { %261 = vmatmul.f32.gmra.mxu0 %v189_v31  ;;  %285 = vmatmul.f32.gmra.mxu1 %v197_v32 }
  0x4d   : > { %309 = vmatmul.f32.gmra.mxu2 %v205_v34  ;;  %333 = vmatmul.f32.gmra.mxu3 %v213_v37 }
  0x53   : > { %264 = vmatmul.f32.gmra.mxu0 %v190_v35  ;;  %288 = vmatmul.f32.gmra.mxu1 %v198_v36 }
  0x55   : > { %312 = vmatmul.f32.gmra.mxu2 %v206_v38  ;;  %336 = vmatmul.f32.gmra.mxu3 %v214_v41 }
  0x5b   : > { %267 = vmatmul.f32.gmra.mxu0 %v191_v39  ;;  %291 = vmatmul.f32.gmra.mxu1 %v199_v40 }
  0x5d   : > { %315 = vmatmul.f32.gmra.mxu2 %v207_v42  ;;  %339 = vmatmul.f32.gmra.mxu3 %v215_v45 }
  0x63   : > { %270 = vmatmul.f32.gmra.mxu0 %v192_v43  ;;  %294 = vmatmul.f32.gmra.mxu1 %v200_v44 }
  0x65   : > { %318 = vmatmul.f32.gmra.mxu2 %v208_v46  ;;  %342 = vmatmul.f32.gmra.mxu3 %v216_v47 }
  0xa8   : > { %v250_v48 = vpop.f32.mrf.mxu0  ;;  %v780_v49 = vpop.f32.mrf.mxu1 }
  0xa9   : > { %346 = vst [vmem:[%s778_s28] sm:$0xff] %v250_v48  ;;  %v415_v6 = vmul.f32 %v250_v48, %v250_v48  ;;  %v423_v34 = vmul.f32 %v780_v49, %v780_v49 }
  0xaa   : > { %354 = vst [vmem:[%s778_s28 + $0x40] sm:$0xff] %v780_v49 }
  0xb0   : > { %v253_v50 = vpop.f32.mrf.mxu0  ;;  %v785_v51 = vpop.f32.mrf.mxu1 }
  0xb1   : > { %347 = vst [vmem:[%s778_s28 + $0x8] sm:$0xff] %v253_v50  ;;  %v788_v52 = vpop.f32.mrf.mxu2  ;;  %v799_v56 = vpop.f32.mrf.mxu3  ;;  %v416_v5 = vmul.f32 %v253_v50, %v253_v50  ;;  %v378_v7 = vadd.f32 %v253_v50, %v250_v48  ;;  %v424_v37 = vmul.f32 %v785_v51, %v785_v51 }
  0xb2   : > { %355 = vst [vmem:[%s778_s28 + $0x48] sm:$0xff] %v785_v51 }
  0xb3   : > { %362 = vst [vmem:[%s778_s28 + $0x80] sm:$0xff] %v788_v52  ;;  %v447_v9 = vadd.f32 %v416_v5, %v415_v6 }
  0xb4   : > { %370 = vst [vmem:[%s778_s28 + $0xc0] sm:$0xff] %v799_v56 }
  0xb8   : > { %v256_v53 = vpop.f32.mrf.mxu0  ;;  %v794_v54 = vpop.f32.mrf.mxu1 }
  0xb9   : > { %348 = vst [vmem:[%s778_s28 + $0x10] sm:$0xff] %v256_v53  ;;  %v797_v55 = vpop.f32.mrf.mxu2  ;;  %v812_v60 = vpop.f32.mrf.mxu3  ;;  %v417_v8 = vmul.f32 %v256_v53, %v256_v53  ;;  %v379_v10 = vadd.f32 %v378_v7, %v256_v53  ;;  %v425_v40 = vmul.f32 %v794_v54, %v794_v54 }
  0xba   : > { %356 = vst [vmem:[%s778_s28 + $0x50] sm:$0xff] %v794_v54 }
  0xbb   : > { %363 = vst [vmem:[%s778_s28 + $0x88] sm:$0xff] %v797_v55  ;;  %v448_v14 = vadd.f32 %v447_v9, %v417_v8  ;;  %v431_v8 = vmul.f32 %v788_v52, %v788_v52 }
  0xbc   : > { %371 = vst [vmem:[%s778_s28 + $0xc8] sm:$0xff] %v812_v60 }
  0xc0   : > { %v259_v57 = vpop.f32.mrf.mxu0  ;;  %v807_v58 = vpop.f32.mrf.mxu1 }
  0xc1   : > { %349 = vst [vmem:[%s778_s28 + $0x18] sm:$0xff] %v259_v57  ;;  %v810_v59 = vpop.f32.mrf.mxu2  ;;  %v825_v0 = vpop.f32.mrf.mxu3  ;;  %v418_v11 = vmul.f32 %v259_v57, %v259_v57  ;;  %v380_v15 = vadd.f32 %v379_v10, %v259_v57  ;;  %v426_v43 = vmul.f32 %v807_v58, %v807_v58  ;;  %v432_v10 = vmul.f32 %v797_v55, %v797_v55 }
  0xc2   : > { %357 = vst [vmem:[%s778_s28 + $0x58] sm:$0xff] %v807_v58 }
  0xc3   : > { %364 = vst [vmem:[%s778_s28 + $0x90] sm:$0xff] %v810_v59  ;;  %v449_v19 = vadd.f32 %v448_v14, %v418_v11 }
  0xc4   : > { %372 = vst [vmem:[%s778_s28 + $0xd0] sm:$0xff] %v825_v0 }
  0xc8   : > { %v262_v61 = vpop.f32.mrf.mxu0  ;;  %v820_v62 = vpop.f32.mrf.mxu1 }
  0xc9   : > { %350 = vst [vmem:[%s778_s28 + $0x20] sm:$0xff] %v262_v61  ;;  %v823_v63 = vpop.f32.mrf.mxu2  ;;  %v838_v4 = vpop.f32.mrf.mxu3  ;;  %v419_v16 = vmul.f32 %v262_v61, %v262_v61  ;;  %v381_v20 = vadd.f32 %v380_v15, %v262_v61  ;;  %v427_v48 = vmul.f32 %v820_v62, %v820_v62 }
  0xca   : > { %358 = vst [vmem:[%s778_s28 + $0x60] sm:$0xff] %v820_v62  ;;  %v434_v15 = vmul.f32 %v823_v63, %v823_v63 }
  0xcb   : > { %365 = vst [vmem:[%s778_s28 + $0x98] sm:$0xff] %v823_v63  ;;  %v450_v22 = vadd.f32 %v449_v19, %v419_v16 }
  0xcc   : > { %373 = vst [vmem:[%s778_s28 + $0xd8] sm:$0xff] %v838_v4 }
  0xd0   : > { %v265_v1 = vpop.f32.mrf.mxu0  ;;  %v833_v2 = vpop.f32.mrf.mxu1 }
  0xd1   : > { %351 = vst [vmem:[%s778_s28 + $0x28] sm:$0xff] %v265_v1  ;;  %v836_v3 = vpop.f32.mrf.mxu2  ;;  %v849_v18 = vpop.f32.mrf.mxu3  ;;  %v420_v21 = vmul.f32 %v265_v1, %v265_v1  ;;  %v382_v23 = vadd.f32 %v381_v20, %v265_v1  ;;  %v428_v53 = vmul.f32 %v833_v2, %v833_v2 }
  0xd2   : > { %359 = vst [vmem:[%s778_s28 + $0x68] sm:$0xff] %v833_v2 }
  0xd3   : > { %366 = vst [vmem:[%s778_s28 + $0xa0] sm:$0xff] %v836_v3  ;;  %v451_v25 = vadd.f32 %v450_v22, %v420_v21 }
  0xd4   : > { %374 = vst [vmem:[%s778_s28 + $0xe0] sm:$0xff] %v849_v18 }
  0xd8   : > { %v268_v12 = vpop.f32.mrf.mxu0  ;;  %v292_v13 = vpop.f32.mrf.mxu1 }
  0xd9   : > { %352 = vst [vmem:[%s778_s28 + $0x30] sm:$0xff] %v268_v12  ;;  %v847_v17 = vpop.f32.mrf.mxu2  ;;  %v421_v24 = vmul.f32 %v268_v12, %v268_v12  ;;  %v383_v26 = vadd.f32 %v382_v23, %v268_v12  ;;  %v857_v33 = vpop.f32.mrf.mxu3  ;;  %v433_v12 = vmul.f32 %v810_v59, %v810_v59 }
  0xda   : > { %360 = vst [vmem:[%s778_s28 + $0x70] sm:$0xff] %v292_v13  ;;  %v436_v22 = vmul.f32 %v847_v17, %v847_v17 }
  0xdb   : > { %367 = vst [vmem:[%s778_s28 + $0xa8] sm:$0xff] %v847_v17  ;;  %v452_v29 = vadd.f32 %v451_v25, %v421_v24 }
  0xdc   : > { %375 = vst [vmem:[%s778_s28 + $0xe8] sm:$0xff] %v857_v33 }
  0xe0   : > { %v271_v27 = vpop.f32.mrf.mxu0  ;;  %v295_v28 = vpop.f32.mrf.mxu1 }
  0xe1   : > { %353 = vst [vmem:[%s778_s28 + $0x38] sm:$0xff] %v271_v27  ;;  %v384_v30 = vadd.f32 %v383_v26, %v271_v27  ;;  %v422_v31 = vmul.f32 %v271_v27, %v271_v27  ;;  %v316_v32 = vpop.f32.mrf.mxu2  ;;  %v340_v47 = vpop.f32.mrf.mxu3  ;;  %v430_v1 = vmul.f32 %v295_v28, %v295_v28 }
  0xe2   : > { %361 = vst [vmem:[%s778_s28 + $0x78] sm:$0xff] %v295_v28  ;;  %v437_v25 = vmul.f32 %v316_v32, %v316_v32 }
  0xe3   : > { %v385_v35 = vadd.f32 %v384_v30, %v780_v49  ;;  %v453_v36 = vadd.f32 %v452_v29, %v422_v31  ;;  %368 = vst [vmem:[%s778_s28 + $0xb0] sm:$0xff] %v316_v32 }
  0xe4   : > { %376 = vst [vmem:[%s778_s28 + $0xf0] sm:$0xff] %v340_v47 }
  0xe5   : > { %v386_v38 = vadd.f32 %v385_v35, %v785_v51  ;;  %v454_v39 = vadd.f32 %v453_v36, %v423_v34  ;;  %v442_v36 = vmul.f32 %v838_v4, %v838_v4 }
  0xe7   : > { %v387_v41 = vadd.f32 %v386_v38, %v794_v54  ;;  %v455_v42 = vadd.f32 %v454_v39, %v424_v37  ;;  %v443_v38 = vmul.f32 %v849_v18, %v849_v18 }
  0xe9   : > { %v456_v44 = vadd.f32 %v455_v42, %v425_v40  ;;  %v388_v45 = vadd.f32 %v387_v41, %v807_v58  ;;  %v319_v46 = vpop.f32.mrf.mxu2  ;;  %v429_v58 = vmul.f32 %v292_v13, %v292_v13  ;;  %v343_v7 = vpop.f32.mrf.mxu3 }
  0xea   : > { %369 = vst [vmem:[%s778_s28 + $0xb8] sm:$0xff] %v319_v46  ;;  %v438_v26 = vmul.f32 %v319_v46, %v319_v46 }
  0xeb   : > { %v389_v49 = vadd.f32 %v388_v45, %v820_v62  ;;  %v457_v50 = vadd.f32 %v456_v44, %v426_v43  ;;  %377 = vst [vmem:[%s778_s28 + $0xf8] sm:$0xff] %v343_v7  ;;  %v445_v44 = vmul.f32 %v340_v47, %v340_v47  ;;  %v446_v45 = vmul.f32 %v343_v7, %v343_v7 }
  0xed   : > { %v390_v51 = vadd.f32 %v389_v49, %v833_v2  ;;  %v458_v54 = vadd.f32 %v457_v50, %v427_v48 }
  0xef   : > { %v459_v57 = vadd.f32 %v458_v54, %v428_v53  ;;  %v391_v61 = vadd.f32 %v390_v51, %v292_v13 }
  0xf1   : > { %v460_v5 = vadd.f32 %v459_v57, %v429_v58  ;;  %v392_v6 = vadd.f32 %v391_v61, %v295_v28 }
  0xf3   : > { %v393_v62 = vadd.f32 %v392_v6, %v788_v52  ;;  %v461_v9 = vadd.f32 %v460_v5, %v430_v1  ;;  %v435_v52 = vmul.f32 %v836_v3, %v836_v3 }
  0xf5   : > { %v394_v2 = vadd.f32 %v393_v62, %v797_v55  ;;  %v462_v11 = vadd.f32 %v461_v9, %v431_v8 }
  0xf7   : > { %v395_v13 = vadd.f32 %v394_v2, %v810_v59  ;;  %v463_v14 = vadd.f32 %v462_v11, %v432_v10 }
  0xf9   : > { %v464_v16 = vadd.f32 %v463_v14, %v433_v12  ;;  %v396_v19 = vadd.f32 %v395_v13, %v823_v63  ;;  %v439_v63 = vmul.f32 %v799_v56, %v799_v56 }
  0xfb   : > { %v397_v20 = vadd.f32 %v396_v19, %v836_v3  ;;  %v465_v21 = vadd.f32 %v464_v16, %v434_v15  ;;  %v440_v3 = vmul.f32 %v812_v60, %v812_v60 }
  0xfd   : > { %v398_v55 = vadd.f32 %v397_v20, %v847_v17  ;;  %v466_v23 = vadd.f32 %v465_v21, %v435_v52  ;;  %v441_v17 = vmul.f32 %v825_v0, %v825_v0 }
  0xff   : > { %v467_v59 = vadd.f32 %v466_v23, %v436_v22  ;;  %v399_v24 = vadd.f32 %v398_v55, %v316_v32 }
 0x101   : > { %v468_v27 = vadd.f32 %v467_v59, %v437_v25  ;;  %v400_v28 = vadd.f32 %v399_v24, %v319_v46 }
 0x103   : > { %v401_v29 = vadd.f32 %v400_v28, %v799_v56  ;;  %v469_v30 = vadd.f32 %v468_v27, %v438_v26 }
 0x105   : > { %v402_v31 = vadd.f32 %v401_v29, %v812_v60  ;;  %v470_v34 = vadd.f32 %v469_v30, %v439_v63 }
 0x107   : > { %v403_v32 = vadd.f32 %v402_v31, %v825_v0  ;;  %v471_v35 = vadd.f32 %v470_v34, %v440_v3  ;;  %v444_v0 = vmul.f32 %v857_v33, %v857_v33 }
 0x109   : > { %v472_v37 = vadd.f32 %v471_v35, %v441_v17  ;;  %v404_v56 = vadd.f32 %v403_v32, %v838_v4 }
 0x10b   : > { %v405_v39 = vadd.f32 %v404_v56, %v849_v18  ;;  %v473_v60 = vadd.f32 %v472_v37, %v442_v36 }
 0x10d   : > { %v406_v40 = vadd.f32 %v405_v39, %v857_v33  ;;  %v474_v41 = vadd.f32 %v473_v60, %v443_v38 }
 0x10f   : > { %v475_v42 = vadd.f32 %v474_v41, %v444_v0  ;;  %v407_v43 = vadd.f32 %v406_v40, %v340_v47 }
 0x111   : > { %v476_v46 = vadd.f32 %v475_v42, %v445_v44  ;;  %v408_v48 = vadd.f32 %v407_v43, %v343_v7 }
 0x113   : > { %v409_v4 = vrot.slane %v408_v48, 4  ;;  %v477_v49 = vadd.f32 %v476_v46, %v446_v45 }
 0x115   : > { %v410_v50 = vadd.f32 %v409_v4, %v408_v48  ;;  %v478_v51 = vrot.slane %v477_v49, 4 }
 0x117   : > { %v411_v18 = vrot.slane %v410_v50, 2  ;;  %v479_v53 = vadd.f32 %v478_v51, %v477_v49 }
 0x119   : > { %v412_v54 = vadd.f32 %v411_v18, %v410_v50  ;;  %v480_v57 = vrot.slane %v479_v53, 2 }
 0x11b   : > { %v413_v61 = vrot.slane %v412_v54, 1  ;;  %v481_v58 = vadd.f32 %v480_v57, %v479_v53 }
 0x11d   : > { %v482_v33 = vrot.slane %v481_v58, 1  ;;  %v414_v1 = vadd.f32 %v413_v61, %v412_v54 }
 0x11f   : > { %v483_v47 = vadd.f32 %v482_v33, %v481_v58 }
 0x121   : > { %v485_v5 = vsel %vm484_vm0, %v414_v1, %v483_v47 }
 0x122   : > { %v487_v6 = vsel %vm486_vm1, %v485_v5, 0.0 }
 0x123   : > { %488 = vst [vmem:[%s184_s5] sm:$0xff] %v487_v6 }
 0x124 PF: > { %s14_s12 = sadd.s32 1, %s650_s12  }
 0x125   : > { %p11_p5 = scmp.ge.s32.totalorder %s14_s12, 4  }
 0x127   :  { %13 = sbr.rel (!%p11_p5) target bundleno = 1 (0x1), region = 70 }

</bundles_post_ra>
